<compile_context>
chip_gen: v6e
topology: v6e:2x2x1
jax: 0.10.0
libtpu: 0.0.40
codegen_flags: <defaults>
</compile_context>

<pallas_src>
import functools

import jax
import jax.numpy as jnp
from jax.experimental import pallas as pl
from jax.experimental.pallas import tpu as pltpu


def _round_up(x, m):
    return ((x + m - 1) // m) * m


def _mlp_kernel(teams_ref,
                w1_ref, b1_ref, w2_ref, b2_ref,
                wc1_ref, bc1_ref, wc2_ref, bc2_ref,
                wo_ref, bo_ref,
                out_ref, *, compute_dtype):
    """Whole forward pass for one batch tile, entirely in VMEM.

    teams_ref: (2, TB, in)  -- [0] = team_a rows, [1] = team_b rows.
    out_ref:   (TB, 1)
    """
    tb = out_ref.shape[0]
    in_size = teams_ref.shape[-1]

    def mm(a, b):
        return jnp.dot(a.astype(compute_dtype), b.astype(compute_dtype),
                       preferred_element_type=jnp.float32)

    # ---- shared team layers, both teams in one matmul (M = 2*TB) ----------
    x = teams_ref[...].reshape(2 * tb, in_size)          # (2*TB, in)
    h = jnp.maximum(mm(x, w1_ref[...]) + b1_ref[...], 0.0)      # (2*TB, 64)
    h = jnp.maximum(mm(h, w2_ref[...]) + b2_ref[...], 0.0)      # (2*TB, 32)

    fa = h[:tb, :]                                        # sublane slice, free
    fb = h[tb:, :]

    # ---- combined_layer1: split-weight accumulation, no lane concat -------
    c = mm(fa, wc1_ref[0:32, :]) + mm(fb, wc1_ref[32:64, :]) + bc1_ref[...]
    c = jnp.maximum(c, 0.0)                               # (TB, 32)

    # ---- combined_layer2 ----------------------------------------------------
    c = jnp.maximum(mm(c, wc2_ref[...]) + bc2_ref[...], 0.0)    # (TB, 16)

    # ---- output layer + sigmoid --------------------------------------------
    logit = mm(c, wo_ref[...]) + bo_ref[...]              # (TB, 1)
    out_ref[...] = jax.nn.sigmoid(logit).astype(out_ref.dtype)


def neural_network_forward(team_a, team_b, params, *,
                           batch_tile=512, compute_dtype=jnp.float32):
    """params: dict with keys w1,b1,w2,b2,wc1,bc1,wc2,bc2,wo,bo (W as (in,out)).

    batch_tile: rows of output per grid step (tunable; 512 default).  On v7x
    pick batch_tile so that (padded_B // batch_tile) >= 2 to keep both
    TensorCores busy.  compute_dtype=jnp.bfloat16 is a good choice on v6e/v7x.
    """
    B, in_size = team_a.shape
    assert team_b.shape == (B, in_size)

    # Effective tile: multiple of 8 sublanes, no larger than the padded batch.
    bt = max(8, min(int(batch_tile), _round_up(B, 8)))
    bt = _round_up(bt, 8)
    Bp = _round_up(B, bt)
    if Bp != B:
        pad = Bp - B
        team_a = jnp.pad(team_a, ((0, pad), (0, 0)))
        team_b = jnp.pad(team_b, ((0, pad), (0, 0)))

    # Single packed input: (2, Bp, in) -> one DMA stream per grid step.
    teams = jnp.stack([team_a, team_b], axis=0)

    w1, b1 = params["w1"], params["b1"]
    w2, b2 = params["w2"], params["b2"]
    wc1, bc1 = params["wc1"], params["bc1"]
    wc2, bc2 = params["wc2"], params["bc2"]
    wo, bo = params["wo"], params["bo"]

    grid = (Bp // bt,)

    def full_spec(shape):
        return pl.BlockSpec(shape, lambda i: (0,) * len(shape))

    out = pl.pallas_call(
        functools.partial(_mlp_kernel, compute_dtype=compute_dtype),
        out_shape=jax.ShapeDtypeStruct((Bp, 1), jnp.float32),
        grid_spec=pltpu.PrefetchScalarGridSpec(
            num_scalar_prefetch=0,
            grid=grid,
            in_specs=[
                pl.BlockSpec((2, bt, in_size), lambda i: (0, i, 0)),  # teams
                full_spec(w1.shape), full_spec(b1.shape),
                full_spec(w2.shape), full_spec(b2.shape),
                full_spec(wc1.shape), full_spec(bc1.shape),
                full_spec(wc2.shape), full_spec(bc2.shape),
                full_spec(wo.shape), full_spec(bo.shape),
            ],
            out_specs=pl.BlockSpec((bt, 1), lambda i: (i, 0)),
        ),
        compiler_params=pltpu.CompilerParams(
            dimension_semantics=("parallel",)),
    )(teams, w1, b1, w2, b2, wc1, bc1, wc2, bc2, wo, bo)

    return out[:B]


def init_params(key, input_size=10):
    """Deterministic init mimicking torch.nn.Linear (uniform +-1/sqrt(fan_in)).
    Weights stored as (in, out) = torch weight.T."""
    dims = [
        ("w1", "b1", input_size, 64),
        ("w2", "b2", 64, 32),
        ("wc1", "bc1", 64, 32),
        ("wc2", "bc2", 32, 16),
        ("wo", "bo", 16, 1),
    ]
    params = {}
    for wname, bname, fan_in, fan_out in dims:
        key, kw, kb = jax.random.split(key, 3)
        bound = 1.0 / jnp.sqrt(fan_in)
        params[wname] = jax.random.uniform(
            kw, (fan_in, fan_out), jnp.float32, -bound, bound)
        params[bname] = jax.random.uniform(
            kb, (1, fan_out), jnp.float32, -bound, bound)
    return params


def reference_forward(team_a, team_b, params):
    """Pure-JAX reference of the PyTorch forward (eval mode)."""
    def process(x):
        h = jnp.maximum(x @ params["w1"] + params["b1"], 0.0)
        h = jnp.maximum(h @ params["w2"] + params["b2"], 0.0)
        return h
    c = jnp.concatenate([process(team_a), process(team_b)], axis=1)
    h = jnp.maximum(c @ params["wc1"] + params["bc1"], 0.0)
    h = jnp.maximum(h @ params["wc2"] + params["bc2"], 0.0)
    return jax.nn.sigmoid(h @ params["wo"] + params["bo"])


if __name__ == "__main__":
    key = jax.random.PRNGKey(0)
    k_p, k_a, k_b = jax.random.split(key, 3)

    input_size = 10
    batch = 64          # small demo batch; wrapper pads/tiles for any B

    params = init_params(k_p, input_size=input_size)
    team_a = jax.random.normal(k_a, (batch, input_size), jnp.float32)
    team_b = jax.random.normal(k_b, (batch, input_size), jnp.float32)

    out = neural_network_forward(team_a, team_b, params, batch_tile=512)
    out = jax.block_until_ready(out)

    ref = reference_forward(team_a, team_b, params)
    assert out.shape == (batch, 1)
    assert jnp.allclose(out, ref, atol=1e-5, rtol=1e-5), (out, ref)

    # TODO(synk): training-mode dropout (p=0.2) not implemented; forward matches eval()/predict() semantics.
    print("KERNEL_OK")
</pallas_src>

<mosaic_0001>
module attributes {stable_mosaic.version = 11 : i64} {
  func.func @_mlp_kernel(%arg0: i32, %arg1: memref<2x64x10xf32, #tpu.memory_space<vmem>>, %arg2: memref<10x64xf32, #tpu.memory_space<vmem>>, %arg3: memref<1x64xf32, #tpu.memory_space<vmem>>, %arg4: memref<64x32xf32, #tpu.memory_space<vmem>>, %arg5: memref<1x32xf32, #tpu.memory_space<vmem>>, %arg6: memref<64x32xf32, #tpu.memory_space<vmem>>, %arg7: memref<1x32xf32, #tpu.memory_space<vmem>>, %arg8: memref<32x16xf32, #tpu.memory_space<vmem>>, %arg9: memref<1x16xf32, #tpu.memory_space<vmem>>, %arg10: memref<16x1xf32, #tpu.memory_space<vmem>>, %arg11: memref<1x1xf32, #tpu.memory_space<vmem>>, %arg12: memref<64x1xf32, #tpu.memory_space<vmem>>) attributes {dimension_semantics = [#tpu.dimension_semantics<parallel>], iteration_bounds = array<i64: 1>, scalar_prefetch = 0 : i64, scratch_operands = 0 : i64, tpu.core_type = #tpu.core_type<tc>, window_params = [{transform_indices = @transform_0, window_bounds = array<i64: 2, 64, 10>}, {pipeline_mode = #tpu.pipeline_mode<synchronous>, transform_indices = @transform_1, window_bounds = array<i64: 10, 64>}, {pipeline_mode = #tpu.pipeline_mode<synchronous>, transform_indices = @transform_2, window_bounds = array<i64: 1, 64>}, {pipeline_mode = #tpu.pipeline_mode<synchronous>, transform_indices = @transform_3, window_bounds = array<i64: 64, 32>}, {pipeline_mode = #tpu.pipeline_mode<synchronous>, transform_indices = @transform_4, window_bounds = array<i64: 1, 32>}, {pipeline_mode = #tpu.pipeline_mode<synchronous>, transform_indices = @transform_5, window_bounds = array<i64: 64, 32>}, {pipeline_mode = #tpu.pipeline_mode<synchronous>, transform_indices = @transform_6, window_bounds = array<i64: 1, 32>}, {pipeline_mode = #tpu.pipeline_mode<synchronous>, transform_indices = @transform_7, window_bounds = array<i64: 32, 16>}, {pipeline_mode = #tpu.pipeline_mode<synchronous>, transform_indices = @transform_8, window_bounds = array<i64: 1, 16>}, {pipeline_mode = #tpu.pipeline_mode<synchronous>, transform_indices = @transform_9, window_bounds = array<i64: 16, 1>}, {pipeline_mode = #tpu.pipeline_mode<synchronous>, transform_indices = @transform_10, window_bounds = array<i64: 1, 1>}, {transform_indices = @transform_11, window_bounds = array<i64: 64, 1>}]} {
    %c0 = arith.constant 0 : index
    %c0_0 = arith.constant 0 : index
    %c0_1 = arith.constant 0 : index
    %0 = vector.load %arg1[%c0, %c0_0, %c0_1] : memref<2x64x10xf32, #tpu.memory_space<vmem>>, vector<2x64x10xf32>
    %1 = vector.shape_cast %0 : vector<2x64x10xf32> to vector<128x10xf32>
    %c0_2 = arith.constant 0 : index
    %c0_3 = arith.constant 0 : index
    %2 = vector.load %arg2[%c0_2, %c0_3] : memref<10x64xf32, #tpu.memory_space<vmem>>, vector<10x64xf32>
    %cst = arith.constant dense<0.000000e+00> : vector<128x64xf32>
    %3 = tpu.matmul %1, %2, %cst {dimension_numbers = #tpu.dot_dimension_numbers<[1], [0], [0], [1], [0, 0, 1, 1], [], []>} : vector<128x10xf32>, vector<10x64xf32>, vector<128x64xf32> -> vector<128x64xf32>
    %c0_4 = arith.constant 0 : index
    %c0_5 = arith.constant 0 : index
    %4 = vector.load %arg3[%c0_4, %c0_5] : memref<1x64xf32, #tpu.memory_space<vmem>>, vector<1x64xf32>
    %5 = vector.broadcast %4 : vector<1x64xf32> to vector<128x64xf32>
    %6 = arith.addf %3, %5 : vector<128x64xf32>
    %cst_6 = arith.constant 0.000000e+00 : f32
    %7 = vector.broadcast %cst_6 : f32 to vector<128x64xf32>
    %8 = arith.maximumf %6, %7 : vector<128x64xf32>
    %c0_7 = arith.constant 0 : index
    %c0_8 = arith.constant 0 : index
    %9 = vector.load %arg4[%c0_7, %c0_8] : memref<64x32xf32, #tpu.memory_space<vmem>>, vector<64x32xf32>
    %cst_9 = arith.constant dense<0.000000e+00> : vector<128x32xf32>
    %10 = tpu.matmul %8, %9, %cst_9 {dimension_numbers = #tpu.dot_dimension_numbers<[1], [0], [0], [1], [0, 0, 1, 1], [], []>} : vector<128x64xf32>, vector<64x32xf32>, vector<128x32xf32> -> vector<128x32xf32>
    %c0_10 = arith.constant 0 : index
    %c0_11 = arith.constant 0 : index
    %11 = vector.load %arg5[%c0_10, %c0_11] : memref<1x32xf32, #tpu.memory_space<vmem>>, vector<1x32xf32>
    %12 = vector.broadcast %11 : vector<1x32xf32> to vector<128x32xf32>
    %13 = arith.addf %10, %12 : vector<128x32xf32>
    %cst_12 = arith.constant 0.000000e+00 : f32
    %14 = vector.broadcast %cst_12 : f32 to vector<128x32xf32>
    %15 = arith.maximumf %13, %14 : vector<128x32xf32>
    %16 = vector.extract_strided_slice %15 {offsets = [0, 0], sizes = [64, 32], strides = [1, 1]} : vector<128x32xf32> to vector<64x32xf32>
    %17 = vector.extract_strided_slice %15 {offsets = [64, 0], sizes = [64, 32], strides = [1, 1]} : vector<128x32xf32> to vector<64x32xf32>
    %c0_13 = arith.constant 0 : index
    %c0_14 = arith.constant 0 : index
    %18 = vector.load %arg6[%c0_13, %c0_14] : memref<64x32xf32, #tpu.memory_space<vmem>>, vector<32x32xf32>
    %cst_15 = arith.constant dense<0.000000e+00> : vector<64x32xf32>
    %19 = tpu.matmul %16, %18, %cst_15 {dimension_numbers = #tpu.dot_dimension_numbers<[1], [0], [0], [1], [0, 0, 1, 1], [], []>} : vector<64x32xf32>, vector<32x32xf32>, vector<64x32xf32> -> vector<64x32xf32>
    %c32 = arith.constant 32 : index
    %c0_16 = arith.constant 0 : index
    %20 = vector.load %arg6[%c32, %c0_16] : memref<64x32xf32, #tpu.memory_space<vmem>>, vector<32x32xf32>
    %cst_17 = arith.constant dense<0.000000e+00> : vector<64x32xf32>
    %21 = tpu.matmul %17, %20, %cst_17 {dimension_numbers = #tpu.dot_dimension_numbers<[1], [0], [0], [1], [0, 0, 1, 1], [], []>} : vector<64x32xf32>, vector<32x32xf32>, vector<64x32xf32> -> vector<64x32xf32>
    %22 = arith.addf %19, %21 : vector<64x32xf32>
    %c0_18 = arith.constant 0 : index
    %c0_19 = arith.constant 0 : index
    %23 = vector.load %arg7[%c0_18, %c0_19] : memref<1x32xf32, #tpu.memory_space<vmem>>, vector<1x32xf32>
    %24 = vector.broadcast %23 : vector<1x32xf32> to vector<64x32xf32>
    %25 = arith.addf %22, %24 : vector<64x32xf32>
    %cst_20 = arith.constant 0.000000e+00 : f32
    %26 = vector.broadcast %cst_20 : f32 to vector<64x32xf32>
    %27 = arith.maximumf %25, %26 : vector<64x32xf32>
    %c0_21 = arith.constant 0 : index
    %c0_22 = arith.constant 0 : index
    %28 = vector.load %arg8[%c0_21, %c0_22] : memref<32x16xf32, #tpu.memory_space<vmem>>, vector<32x16xf32>
    %cst_23 = arith.constant dense<0.000000e+00> : vector<64x16xf32>
    %29 = tpu.matmul %27, %28, %cst_23 {dimension_numbers = #tpu.dot_dimension_numbers<[1], [0], [0], [1], [0, 0, 1, 1], [], []>} : vector<64x32xf32>, vector<32x16xf32>, vector<64x16xf32> -> vector<64x16xf32>
    %c0_24 = arith.constant 0 : index
    %c0_25 = arith.constant 0 : index
    %30 = vector.load %arg9[%c0_24, %c0_25] : memref<1x16xf32, #tpu.memory_space<vmem>>, vector<1x16xf32>
    %31 = vector.broadcast %30 : vector<1x16xf32> to vector<64x16xf32>
    %32 = arith.addf %29, %31 : vector<64x16xf32>
    %cst_26 = arith.constant 0.000000e+00 : f32
    %33 = vector.broadcast %cst_26 : f32 to vector<64x16xf32>
    %34 = arith.maximumf %32, %33 : vector<64x16xf32>
    %c0_27 = arith.constant 0 : index
    %c0_28 = arith.constant 0 : index
    %35 = vector.load %arg10[%c0_27, %c0_28] : memref<16x1xf32, #tpu.memory_space<vmem>>, vector<16x1xf32>
    %cst_29 = arith.constant dense<0.000000e+00> : vector<64x1xf32>
    %36 = tpu.matmul %34, %35, %cst_29 {dimension_numbers = #tpu.dot_dimension_numbers<[1], [0], [0], [1], [0, 0, 1, 1], [], []>} : vector<64x16xf32>, vector<16x1xf32>, vector<64x1xf32> -> vector<64x1xf32>
    %c0_30 = arith.constant 0 : index
    %c0_31 = arith.constant 0 : index
    %37 = vector.load %arg11[%c0_30, %c0_31] : memref<1x1xf32, #tpu.memory_space<vmem>>, vector<1x1xf32>
    %38 = vector.broadcast %37 : vector<1x1xf32> to vector<64x1xf32>
    %39 = arith.addf %36, %38 : vector<64x1xf32>
    %40 = arith.negf %39 : vector<64x1xf32>
    %41 = math.exp %40 : vector<64x1xf32>
    %cst_32 = arith.constant 1.000000e+00 : f32
    %42 = vector.broadcast %cst_32 : f32 to vector<64x1xf32>
    %43 = arith.addf %42, %41 : vector<64x1xf32>
    %44 = arith.divf %42, %43 : vector<64x1xf32>
    %c0_33 = arith.constant 0 : index
    %c0_34 = arith.constant 0 : index
    %45 = vector.load %arg12[%c0_33, %c0_34] : memref<64x1xf32, #tpu.memory_space<vmem>>, vector<64x1xf32>
    tpu.vector_store %arg12[%c0_33, %c0_34], %44 {strides = array<i32>} : memref<64x1xf32, #tpu.memory_space<vmem>>, vector<64x1xf32>,
    return
  }
  func.func @transform_0(%arg0: i32) -> (i32, i32, i32) {
    %c0_i32 = arith.constant 0 : i32
    %c0_i32_0 = arith.constant 0 : i32
    %c0_i32_1 = arith.constant 0 : i32
    return %c0_i32, %arg0, %c0_i32_0 : i32, i32, i32
  }
  func.func @transform_1(%arg0: i32) -> (i32, i32) {
    %c0_i32 = arith.constant 0 : i32
    %c0_i32_0 = arith.constant 0 : i32
    %c0_i32_1 = arith.constant 0 : i32
    return %c0_i32, %c0_i32_0 : i32, i32
  }
  func.func @transform_2(%arg0: i32) -> (i32, i32) {
    %c0_i32 = arith.constant 0 : i32
    %c0_i32_0 = arith.constant 0 : i32
    %c0_i32_1 = arith.constant 0 : i32
    return %c0_i32, %c0_i32_0 : i32, i32
  }
  func.func @transform_3(%arg0: i32) -> (i32, i32) {
    %c0_i32 = arith.constant 0 : i32
    %c0_i32_0 = arith.constant 0 : i32
    %c0_i32_1 = arith.constant 0 : i32
    return %c0_i32, %c0_i32_0 : i32, i32
  }
  func.func @transform_4(%arg0: i32) -> (i32, i32) {
    %c0_i32 = arith.constant 0 : i32
    %c0_i32_0 = arith.constant 0 : i32
    %c0_i32_1 = arith.constant 0 : i32
    return %c0_i32, %c0_i32_0 : i32, i32
  }
  func.func @transform_5(%arg0: i32) -> (i32, i32) {
    %c0_i32 = arith.constant 0 : i32
    %c0_i32_0 = arith.constant 0 : i32
    %c0_i32_1 = arith.constant 0 : i32
    return %c0_i32, %c0_i32_0 : i32, i32
  }
  func.func @transform_6(%arg0: i32) -> (i32, i32) {
    %c0_i32 = arith.constant 0 : i32
    %c0_i32_0 = arith.constant 0 : i32
    %c0_i32_1 = arith.constant 0 : i32
    return %c0_i32, %c0_i32_0 : i32, i32
  }
  func.func @transform_7(%arg0: i32) -> (i32, i32) {
    %c0_i32 = arith.constant 0 : i32
    %c0_i32_0 = arith.constant 0 : i32
    %c0_i32_1 = arith.constant 0 : i32
    return %c0_i32, %c0_i32_0 : i32, i32
  }
  func.func @transform_8(%arg0: i32) -> (i32, i32) {
    %c0_i32 = arith.constant 0 : i32
    %c0_i32_0 = arith.constant 0 : i32
    %c0_i32_1 = arith.constant 0 : i32
    return %c0_i32, %c0_i32_0 : i32, i32
  }
  func.func @transform_9(%arg0: i32) -> (i32, i32) {
    %c0_i32 = arith.constant 0 : i32
    %c0_i32_0 = arith.constant 0 : i32
    %c0_i32_1 = arith.constant 0 : i32
    return %c0_i32, %c0_i32_0 : i32, i32
  }
  func.func @transform_10(%arg0: i32) -> (i32, i32) {
    %c0_i32 = arith.constant 0 : i32
    %c0_i32_0 = arith.constant 0 : i32
    %c0_i32_1 = arith.constant 0 : i32
    return %c0_i32, %c0_i32_0 : i32, i32
  }
  func.func @transform_11(%arg0: i32) -> (i32, i32) {
    %c0_i32 = arith.constant 0 : i32
    %c0_i32_0 = arith.constant 0 : i32
    return %arg0, %c0_i32 : i32, i32
  }
}

</mosaic_0001>

<bundles_post_ra>
// kernel: tpu_custom_call.1
= control target key start
LH: loop header
LB: loop body
LE: loop exit
PB: predicated region body
PF: predicated region fallthrough
CT: control target
= control target key end

     0   :  { %vm114_vm0 = vcmask 1041408   ;;  %vm65_vm1 = vcmask 80896   ;;  %vm294_vm2 = vcmask 523264   ;;  %vm512_vm3 = vcmask 261120   ;;  %s1797_s1 = inlined_call_operand.vmem [shape: f32[10,64], index: 1, kind: input, shape index: {}]   ;;  %s1798_s0 = inlined_call_operand.vmem [shape: f32[2,64,10], index: 0, kind: input, shape index: {}]   ;;  %s1799_s3 = inlined_call_operand.vmem [shape: f32[64,32], index: 3, kind: input, shape index: {}]   ;;  %s1800_s5 = inlined_call_operand.vmem [shape: f32[64,32], index: 5, kind: input, shape index: {}]   ;;  %s1801_s2 = inlined_call_operand.vmem [shape: f32[1,64], index: 2, kind: input, shape index: {}]   ;;  %s1802_s4 = inlined_call_operand.vmem [shape: f32[1,32], index: 4, kind: input, shape index: {}]   ;;  %s1803_s7 = inlined_call_operand.vmem [shape: f32[32,16], index: 7, kind: input, shape index: {}]   ;;  %s1804_s9 = inlined_call_operand.vmem [shape: f32[16,1], index: 9, kind: input, shape index: {}]   ;;  %s1805_s6 = inlined_call_operand.vmem [shape: f32[1,32], index: 6, kind: input, shape index: {}]   ;;  %s1806_s10 = inlined_call_operand.<no memory space> [shape: f32[1,1], index: 10, kind: input, shape index: {}]   ;;  %s1807_s8 = inlined_call_operand.vmem [shape: f32[1,16], index: 8, kind: input, shape index: {}]   ;;  %s1808_s11 = inlined_call_operand.vmem [shape: f32[64,1], index: 11, kind: output, shape index: {}]  }
   0x1   :  { %v57_v0 = vld [vmem:[%s1797_s1 + $0x8] sm:$0x3]  ;;  %v56_v1 = vld [vmem:[%s1797_s1] sm:$0xff]  ;;  %v42_v4 = vld [vmem:[%s1798_s0 + $0x10] sm:$0xff]  ;;  %vm951_vm4 = vcmask 130048   ;;  %vm1129_vm5 = vcmask 7168  }
   0x2   :  { %v40_v2 = vld [vmem:[%s1798_s0] sm:$0xff]  ;;  %1308 = vmatprep.subr.msk.mxu0 %vm114_vm0, %v57_v0  ;;  %v41_v3 = vld [vmem:[%s1798_s0 + $0x8] sm:$0xff]  ;;  %v43_v5 = vld [vmem:[%s1798_s0 + $0x18] sm:$0xff] }
   0x3   :  { %1312 = vmatprep.mubr.msk.f32.mxu0 %vm65_vm1, %v40_v2  ;;  %1309 = vmatpush3.msk.msra.mxu0 %vm114_vm0, %v57_v0  ;;  %v286_v6 = vld [vmem:[%s1799_s3 + $0x38] sm:$0xff]  ;;  %v285_v7 = vld [vmem:[%s1799_s3 + $0x30] sm:$0xff]  ;;  %v44_v8 = vld [vmem:[%s1798_s0 + $0x20] sm:$0xff] }
   0x4   :  { %1310 = vmatprep.subr.mxu0 %v56_v1  ;;  %1336 = vmatprep.subr.mxu1 %v286_v6  ;;  %v284_v9 = vld [vmem:[%s1799_s3 + $0x28] sm:$0xff]  ;;  %v283_v11 = vld [vmem:[%s1799_s3 + $0x20] sm:$0xff]  ;;  %v46_v12 = vld [vmem:[%s1798_s0 + $0x30] sm:$0xff] }
   0x5   :  { %1311 = vmatpush3.msra.mxu0 %v56_v1  ;;  %1337 = vmatpush3.msra.mxu1 %v286_v6  ;;  %v45_v10 = vld [vmem:[%s1798_s0 + $0x28] sm:$0xff]  ;;  %v47_v13 = vld [vmem:[%s1798_s0 + $0x38] sm:$0xff]  ;;  %v48_v14 = vld [vmem:[%s1798_s0 + $0x40] sm:$0xff] }
   0x6   :  { %1313 = vmatmul.mubr.msk.f32.vlgmr.msra.gmra.mxu0 %vm65_vm1, %v41_v3  ;;  %1338 = vmatprep.subr.mxu1 %v285_v7  ;;  %v49_v15 = vld [vmem:[%s1798_s0 + $0x48] sm:$0xff]  ;;  %v50_v16 = vld [vmem:[%s1798_s0 + $0x50] sm:$0xff]  ;;  %v51_v17 = vld [vmem:[%s1798_s0 + $0x58] sm:$0xff] }
   0x7   :  { %1315 = vmatprep.mubr.msk.f32.mxu0 %vm65_vm1, %v42_v4  ;;  %1339 = vmatpush3.msra.mxu1 %v285_v7  ;;  %v52_v18 = vld [vmem:[%s1798_s0 + $0x60] sm:$0xff]  ;;  %v53_v19 = vld [vmem:[%s1798_s0 + $0x68] sm:$0xff]  ;;  %v54_v20 = vld [vmem:[%s1798_s0 + $0x70] sm:$0xff] }
   0x8   :  { %1340 = vmatprep.subr.mxu1 %v284_v9  ;;  %v55_v21 = vld [vmem:[%s1798_s0 + $0x78] sm:$0xff]  ;;  %v281_v23 = vld [vmem:[%s1799_s3 + $0x10] sm:$0xff]  ;;  %v280_v24 = vld [vmem:[%s1799_s3 + $0x8] sm:$0xff] }
   0x9   :  { %1341 = vmatpush3.msra.mxu1 %v284_v9  ;;  %v282_v22 = vld [vmem:[%s1799_s3 + $0x18] sm:$0xff]  ;;  %v279_v25 = vld [vmem:[%s1799_s3] sm:$0xff]  ;;  %v510_v28 = vld [vmem:[%s1800_s5 + $0x30] sm:$0xff] }
   0xa   :  { %1316 = vmatmul.mubr.msk.f32.gmra.mxu0 %vm65_vm1, %v43_v5  ;;  %1342 = vmatprep.subr.mxu1 %v283_v11  ;;  %v511_v26 = vld [vmem:[%s1800_s5 + $0x38] sm:$0xff]  ;;  %v1654_v29 = vld [vmem:[%s1801_s2] ss:$0 sm:$0xff]  ;;  %v506_v40 = vld [vmem:[%s1800_s5 + $0x10] sm:$0xff] }
   0xb   :  { %1318 = vmatprep.mubr.msk.f32.mxu0 %vm65_vm1, %v44_v8  ;;  %1343 = vmatpush3.msra.mxu1 %v283_v11  ;;  %v507_v27 = vld [vmem:[%s1800_s5 + $0x18] sm:$0xff] }
   0xc   :  { %1344 = vmatprep.subr.mxu1 %v282_v22  ;;  %1376 = vmatprep.subr.mxu0 %v511_v26 }
   0xd   :  { %1345 = vmatpush3.msra.mxu1 %v282_v22  ;;  %1377 = vmatpush3.msra.mxu0 %v511_v26 }
   0xe   :  { %1319 = vmatmul.mubr.msk.f32.gmra.mxu0 %vm65_vm1, %v45_v10  ;;  %1346 = vmatprep.subr.mxu1 %v281_v23 }
   0xf   :  { %1321 = vmatprep.mubr.msk.f32.mxu0 %vm65_vm1, %v46_v12  ;;  %1347 = vmatpush3.msra.mxu1 %v281_v23 }
  0x10   :  { %1348 = vmatprep.subr.mxu1 %v280_v24  ;;  %1378 = vmatprep.subr.mxu0 %v510_v28 }
  0x11   :  { %1349 = vmatpush3.msra.mxu1 %v280_v24  ;;  %1379 = vmatpush3.msra.mxu0 %v510_v28 }
  0x12   :  { %1322 = vmatmul.mubr.msk.f32.gmra.mxu0 %vm65_vm1, %v47_v13  ;;  %1350 = vmatprep.subr.mxu1 %v279_v25 }
  0x13   :  { %1324 = vmatprep.mubr.msk.f32.mxu0 %vm65_vm1, %v48_v14  ;;  %1351 = vmatpush3.msra.mxu1 %v279_v25 }
  0x14   :  { %1396 = vmatprep.subr.mxu1 %v507_v27 }
  0x16   :  { %1325 = vmatmul.mubr.msk.f32.gmra.mxu0 %vm65_vm1, %v49_v15  ;;  %v505_v15 = vld [vmem:[%s1800_s5 + $0x8] sm:$0xff] }
  0x17   :  { %1327 = vmatprep.mubr.msk.f32.mxu0 %vm65_vm1, %v50_v16  ;;  %v504_v16 = vld [vmem:[%s1800_s5] sm:$0xff] }
  0x1a   :  { %1328 = vmatmul.mubr.msk.f32.gmra.mxu0 %vm65_vm1, %v51_v17  ;;  %v509_v17 = vld [vmem:[%s1800_s5 + $0x28] sm:$0xff] }
  0x1b   :  { %1330 = vmatprep.mubr.msk.f32.mxu0 %vm65_vm1, %v52_v18  ;;  %1380 = vmatprep.subr.mxu0 %v509_v17  ;;  %v508_v18 = vld [vmem:[%s1800_s5 + $0x20] sm:$0xff] }
  0x1c   :  { %1381 = vmatpush3.msra.mxu0 %v509_v17 }
  0x1d   :  { %1382 = vmatprep.subr.mxu0 %v508_v18 }
  0x1e   :  { %1331 = vmatmul.mubr.msk.f32.gmra.mxu0 %vm65_vm1, %v53_v19  ;;  %v1160_v19 = vld [vmem:[%s1802_s4] ss:$0 sm:$0xff] }
  0x1f   :  { %1333 = vmatprep.mubr.msk.f32.mxu0 %vm65_vm1, %v54_v20  ;;  %1383 = vmatpush3.msra.mxu0 %v508_v18 }
  0x22   :  { %1334 = vmatmul.mubr.msk.f32.gmra.mxu0 %vm65_vm1, %v55_v21 }
  0xc6   :  { %v1314_v30 = vpop.f32.mrf.mxu0 }
  0xc7   :  { %v190_v31 = vadd.f32 %v1314_v30, %v1654_v29 }
  0xc8   :  { %v184_v32 = vpop.f32.mrf.mxu0 }
  0xc9   :  { %v185_v33 = vadd.f32 %v1654_v29, %v184_v32  ;;  %v264_v36 = vmax.f32 %v190_v31, 0.0 }
  0xca   :  { %v1317_v34 = vpop.f32.mrf.mxu0 }
  0xcb   :  { %v263_v35 = vmax.f32 %v185_v33, 0.0  ;;  %v200_v37 = vadd.f32 %v1317_v34, %v1654_v29 }
  0xcc   :  { %v194_v38 = vpop.f32.mrf.mxu0 }
  0xcd   :  { %v195_v39 = vadd.f32 %v1654_v29, %v194_v38  ;;  %1352 = vmatprep.mubr.msk.f32.mxu1 %vm294_vm2, %v263_v35  ;;  %v266_v43 = vmax.f32 %v200_v37, 0.0 }
  0xce   :  { %v1320_v41 = vpop.f32.mrf.mxu0  ;;  %1353 = vmatmul.mubr.msk.f32.vlgmr.msra.gmra.mxu1 %vm294_vm2, %v264_v36 }
  0xcf   :  { %v265_v42 = vmax.f32 %v195_v39, 0.0  ;;  %1397 = vmatpush3.msra.mxu1 %v507_v27  ;;  %v210_v44 = vadd.f32 %v1320_v41, %v1654_v29 }
  0xd0   :  { %v204_v45 = vpop.f32.mrf.mxu0  ;;  %1398 = vmatprep.subr.mxu1 %v506_v40 }
  0xd1   :  { %v205_v46 = vadd.f32 %v1654_v29, %v204_v45  ;;  %1355 = vmatprep.mubr.msk.f32.mxu1 %vm294_vm2, %v265_v42  ;;  %1399 = vmatpush3.msra.mxu1 %v506_v40  ;;  %v268_v49 = vmax.f32 %v210_v44, 0.0 }
  0xd2   :  { %v1323_v47 = vpop.f32.mrf.mxu0  ;;  %1356 = vmatmul.mubr.msk.f32.gmra.mxu1 %vm294_vm2, %v266_v43  ;;  %1400 = vmatprep.subr.mxu1 %v505_v15 }
  0xd3   :  { %v267_v48 = vmax.f32 %v205_v46, 0.0  ;;  %v220_v50 = vadd.f32 %v1323_v47, %v1654_v29  ;;  %1401 = vmatpush3.msra.mxu1 %v505_v15  ;;  %v1193_v15 = vld [vmem:[%s1805_s6] ss:$0 sm:$0xff] }
  0xd4   :  { %v214_v51 = vpop.f32.mrf.mxu0  ;;  %1402 = vmatprep.subr.mxu1 %v504_v16 }
  0xd5   :  { %v215_v52 = vadd.f32 %v1654_v29, %v214_v51  ;;  %1358 = vmatprep.mubr.msk.f32.mxu1 %vm294_vm2, %v267_v48  ;;  %v270_v55 = vmax.f32 %v220_v50, 0.0  ;;  %1403 = vmatpush3.msra.mxu1 %v504_v16 }
  0xd6   :  { %v1326_v53 = vpop.f32.mrf.mxu0  ;;  %1359 = vmatmul.mubr.msk.f32.gmra.mxu1 %vm294_vm2, %v268_v49 }
  0xd7   :  { %v269_v54 = vmax.f32 %v215_v52, 0.0  ;;  %v230_v56 = vadd.f32 %v1326_v53, %v1654_v29 }
  0xd8   :  { %v224_v57 = vpop.f32.mrf.mxu0 }
  0xd9   :  { %v225_v58 = vadd.f32 %v1654_v29, %v224_v57  ;;  %1361 = vmatprep.mubr.msk.f32.mxu1 %vm294_vm2, %v269_v54  ;;  %v272_v61 = vmax.f32 %v230_v56, 0.0 }
  0xda   :  { %v1329_v59 = vpop.f32.mrf.mxu0  ;;  %1362 = vmatmul.mubr.msk.f32.gmra.mxu1 %vm294_vm2, %v270_v55 }
  0xdb   :  { %v271_v60 = vmax.f32 %v225_v58, 0.0  ;;  %v240_v62 = vadd.f32 %v1329_v59, %v1654_v29 }
  0xdc   :  { %v234_v63 = vpop.f32.mrf.mxu0 }
  0xdd   :  { %v235_v0 = vadd.f32 %v1654_v29, %v234_v63  ;;  %1364 = vmatprep.mubr.msk.f32.mxu1 %vm294_vm2, %v271_v60  ;;  %v274_v3 = vmax.f32 %v240_v62, 0.0 }
  0xde   :  { %v1332_v1 = vpop.f32.mrf.mxu0  ;;  %1365 = vmatmul.mubr.msk.f32.gmra.mxu1 %vm294_vm2, %v272_v61 }
  0xdf   :  { %v273_v2 = vmax.f32 %v235_v0, 0.0  ;;  %v250_v4 = vadd.f32 %v1332_v1, %v1654_v29 }
  0xe0   :  { %v244_v5 = vpop.f32.mrf.mxu0 }
  0xe1   :  { %v245_v6 = vadd.f32 %v1654_v29, %v244_v5  ;;  %1367 = vmatprep.mubr.msk.f32.mxu1 %vm294_vm2, %v273_v2  ;;  %v276_v9 = vmax.f32 %v250_v4, 0.0  ;;  %v797_v4 = vld [vmem:[%s1803_s7 + $0x18] sm:$0xff]  ;;  %v796_v5 = vld [vmem:[%s1803_s7 + $0x10] sm:$0xff] }
  0xe2   :  { %v1335_v7 = vpop.f32.mrf.mxu0  ;;  %1368 = vmatmul.mubr.msk.f32.gmra.mxu1 %vm294_vm2, %v274_v3  ;;  %1416 = vmatprep.subr.mxu0 %v797_v4 }
  0xe3   :  { %v275_v8 = vmax.f32 %v245_v6, 0.0  ;;  %v260_v10 = vadd.f32 %v1335_v7, %v1654_v29  ;;  %v795_v6 = vld [vmem:[%s1803_s7 + $0x8] sm:$0xff]  ;;  %v794_v7 = vld [vmem:[%s1803_s7] sm:$0xff] }
  0xe4   :  { %v254_v11 = vpop.f32.mrf.mxu0 }
  0xe5   :  { %v255_v12 = vadd.f32 %v1654_v29, %v254_v11  ;;  %1370 = vmatprep.mubr.msk.f32.mxu1 %vm294_vm2, %v275_v8  ;;  %v278_v14 = vmax.f32 %v260_v10, 0.0  ;;  %v943_v8 = vld [vmem:[%s1804_s9 + $0x8] sm:$0xff] }
  0xe6   :  { %1371 = vmatmul.mubr.msk.f32.gmra.mxu1 %vm294_vm2, %v276_v9  ;;  %1452 = vmatprep.subr.mxu1 %v943_v8 }
  0xe7   :  { %v277_v13 = vmax.f32 %v255_v12, 0.0 }
  0xe9   :  { %1373 = vmatprep.mubr.msk.f32.mxu1 %vm294_vm2, %v277_v13 }
  0xea   :  { %1374 = vmatmul.mubr.msk.f32.gmra.mxu1 %vm294_vm2, %v278_v14 }
 0x18e   :  { %v1354_v20 = vpop.f32.mrf.mxu1 }
 0x18f   :  { %v415_v21 = vadd.f32 %v1354_v20, %v1160_v19 }
 0x190   :  { %v409_v22 = vpop.f32.mrf.mxu1 }
 0x191   :  { %v410_v23 = vadd.f32 %v1160_v19, %v409_v22  ;;  %v489_v26 = vmax.f32 %v415_v21, 0.0 }
 0x192   :  { %v1357_v24 = vpop.f32.mrf.mxu1 }
 0x193   :  { %v488_v25 = vmax.f32 %v410_v23, 0.0  ;;  %v425_v27 = vadd.f32 %v1357_v24, %v1160_v19 }
 0x194   :  { %v419_v28 = vpop.f32.mrf.mxu1 }
 0x195   :  { %v420_v29 = vadd.f32 %v1160_v19, %v419_v28  ;;  %1404 = vmatprep.mubr.msk.f32.mxu1 %vm512_vm3, %v488_v25  ;;  %v491_v32 = vmax.f32 %v425_v27, 0.0 }
 0x196   :  { %v1360_v30 = vpop.f32.mrf.mxu1  ;;  %1405 = vmatmul.mubr.msk.f32.vlgmr.msra.gmra.mxu1 %vm512_vm3, %v489_v26 }
 0x197   :  { %v490_v31 = vmax.f32 %v420_v29, 0.0  ;;  %v435_v33 = vadd.f32 %v1360_v30, %v1160_v19  ;;  %1454 = vmatpush3.msra.mxu1 %v943_v8 }
 0x198   :  { %v429_v34 = vpop.f32.mrf.mxu1 }
 0x199   :  { %v430_v35 = vadd.f32 %v1160_v19, %v429_v34  ;;  %1407 = vmatprep.mubr.msk.f32.mxu1 %vm512_vm3, %v490_v31  ;;  %v493_v38 = vmax.f32 %v435_v33, 0.0 }
 0x19a   :  { %v1363_v36 = vpop.f32.mrf.mxu1  ;;  %1408 = vmatmul.mubr.msk.f32.gmra.mxu1 %vm512_vm3, %v491_v32 }
 0x19b   :  { %v492_v37 = vmax.f32 %v430_v35, 0.0  ;;  %v445_v39 = vadd.f32 %v1363_v36, %v1160_v19 }
 0x19c   :  { %v439_v40 = vpop.f32.mrf.mxu1 }
 0x19d   :  { %v440_v41 = vadd.f32 %v1160_v19, %v439_v40  ;;  %1410 = vmatprep.mubr.msk.f32.mxu1 %vm512_vm3, %v492_v37  ;;  %v495_v44 = vmax.f32 %v445_v39, 0.0 }
 0x19e   :  { %v1366_v42 = vpop.f32.mrf.mxu1  ;;  %1411 = vmatmul.mubr.msk.f32.gmra.mxu1 %vm512_vm3, %v493_v38 }
 0x19f   :  { %v494_v43 = vmax.f32 %v440_v41, 0.0  ;;  %v455_v45 = vadd.f32 %v1366_v42, %v1160_v19 }
 0x1a0   :  { %v449_v46 = vpop.f32.mrf.mxu1 }
 0x1a1   :  { %v450_v47 = vadd.f32 %v1160_v19, %v449_v46  ;;  %1413 = vmatprep.mubr.msk.f32.mxu1 %vm512_vm3, %v494_v43  ;;  %v497_v50 = vmax.f32 %v455_v45, 0.0 }
 0x1a2   :  { %v1369_v48 = vpop.f32.mrf.mxu1  ;;  %1414 = vmatmul.mubr.msk.f32.gmra.mxu1 %vm512_vm3, %v495_v44 }
 0x1a3   :  { %v496_v49 = vmax.f32 %v450_v47, 0.0  ;;  %v465_v51 = vadd.f32 %v1369_v48, %v1160_v19 }
 0x1a4   :  { %v459_v52 = vpop.f32.mrf.mxu1 }
 0x1a5   :  { %v460_v53 = vadd.f32 %v1160_v19, %v459_v52  ;;  %1384 = vmatprep.mubr.msk.f32.mxu0 %vm512_vm3, %v496_v49  ;;  %v499_v56 = vmax.f32 %v465_v51, 0.0  ;;  %v16_v51 = vstv %s1806_s10  ;;  %v1194_v52 = vld [vmem:[%s1807_s8] ss:$0 sm:$0xff] }
 0x1a6   :  { %v1372_v54 = vpop.f32.mrf.mxu1  ;;  %1385 = vmatmul.mubr.msk.f32.vlgmr.msra.gmra.mxu0 %vm512_vm3, %v497_v50  ;;  %v942_v50 = vld [vmem:[%s1804_s9] sm:$0xff]  ;;  %17 = vst [vmem:[#allocation2] sm:$0x1] %v16_v51 }
 0x1a7   :  { %v498_v55 = vmax.f32 %v460_v53, 0.0  ;;  %v475_v57 = vadd.f32 %v1372_v54, %v1160_v19  ;;  %1417 = vmatpush3.msra.mxu0 %v797_v4  ;;  %1453 = vmatprep.subr.mxu1 %v942_v50 }
 0x1a8   :  { %v469_v58 = vpop.f32.mrf.mxu1  ;;  %1418 = vmatprep.subr.mxu0 %v796_v5  ;;  %1455 = vmatpush3.msra.mxu1 %v942_v50 }
 0x1a9   :  { %v470_v59 = vadd.f32 %v1160_v19, %v469_v58  ;;  %1387 = vmatprep.mubr.msk.f32.mxu0 %vm512_vm3, %v498_v55  ;;  %v501_v62 = vmax.f32 %v475_v57, 0.0  ;;  %1419 = vmatpush3.msra.mxu0 %v796_v5 }
 0x1aa   :  { %v1375_v60 = vpop.f32.mrf.mxu1  ;;  %1388 = vmatmul.mubr.msk.f32.gmra.mxu0 %vm512_vm3, %v499_v56  ;;  %1420 = vmatprep.subr.mxu0 %v795_v6 }
 0x1ab   :  { %v500_v61 = vmax.f32 %v470_v59, 0.0  ;;  %v485_v63 = vadd.f32 %v1375_v60, %v1160_v19  ;;  %1421 = vmatpush3.msra.mxu0 %v795_v6 }
 0x1ac   :  { %v479_v0 = vpop.f32.mrf.mxu1  ;;  %1422 = vmatprep.subr.mxu0 %v794_v7 }
 0x1ad   :  { %v480_v1 = vadd.f32 %v1160_v19, %v479_v0  ;;  %1390 = vmatprep.mubr.msk.f32.mxu0 %vm512_vm3, %v500_v61  ;;  %v503_v3 = vmax.f32 %v485_v63, 0.0  ;;  %1423 = vmatpush3.msra.mxu0 %v794_v7 }
 0x1ae   :  { %1391 = vmatmul.mubr.msk.f32.gmra.mxu0 %vm512_vm3, %v501_v62  ;;  %1436 = vmatprep.subr.mxu0 %v943_v8 }
 0x1af   :  { %v502_v2 = vmax.f32 %v480_v1, 0.0 }
 0x1b1   :  { %1393 = vmatprep.mubr.msk.f32.mxu0 %vm512_vm3, %v502_v2 }
 0x1b2   :  { %1394 = vmatmul.mubr.msk.f32.gmra.mxu0 %vm512_vm3, %v503_v3 }
 0x256   :  { %v1406_v9 = vpop.f32.mrf.mxu1 }
 0x258   :  { %v732_v10 = vpop.f32.mrf.mxu1 }
 0x25a   :  { %v1409_v11 = vpop.f32.mrf.mxu1 }
 0x25c   :  { %v742_v12 = vpop.f32.mrf.mxu1 }
 0x25e   :  { %v1412_v16 = vpop.f32.mrf.mxu1 }
 0x260   :  { %v752_v23 = vpop.f32.mrf.mxu1 }
 0x262   :  { %v1415_v32 = vpop.f32.mrf.mxu1 }
 0x264   :  { %v762_v41 = vpop.f32.mrf.mxu1 }
 0x266   :  { %v1386_v13 = vpop.f32.mrf.mxu0 }
 0x267   :  { %v738_v14 = vadd.f32 %v1406_v9, %v1386_v13  ;;  %v1203_v13 = vld [vmem:[#allocation2] ss:$0 sm:$0xff] }
 0x268   :  { %v603_v17 = vpop.f32.mrf.mxu0 }
 0x269   :  { %v733_v18 = vadd.f32 %v732_v10, %v603_v17  ;;  %v779_v19 = vadd.f32 %v1193_v15, %v738_v14 }
 0x26a   :  { %v1389_v20 = vpop.f32.mrf.mxu0 }
 0x26b   :  { %v778_v21 = vadd.f32 %v1193_v15, %v733_v18  ;;  %v748_v22 = vadd.f32 %v1409_v11, %v1389_v20  ;;  %v787_v27 = vmax.f32 %v779_v19, 0.0 }
 0x26c   :  { %v613_v24 = vpop.f32.mrf.mxu0 }
 0x26d   :  { %v786_v25 = vmax.f32 %v778_v21, 0.0  ;;  %v743_v26 = vadd.f32 %v742_v12, %v613_v24  ;;  %v781_v28 = vadd.f32 %v1193_v15, %v748_v22 }
 0x26e   :  { %v1392_v29 = vpop.f32.mrf.mxu0 }
 0x26f   :  { %v780_v30 = vadd.f32 %v1193_v15, %v743_v26  ;;  %v758_v31 = vadd.f32 %v1412_v16, %v1392_v29  ;;  %1424 = vmatprep.mubr.msk.f32.mxu0 %vm512_vm3, %v786_v25  ;;  %v789_v36 = vmax.f32 %v781_v28, 0.0 }
 0x270   :  { %v623_v33 = vpop.f32.mrf.mxu0  ;;  %1425 = vmatmul.mubr.msk.f32.vlgmr.msra.gmra.mxu0 %vm512_vm3, %v787_v27 }
 0x271   :  { %v788_v34 = vmax.f32 %v780_v30, 0.0  ;;  %v753_v35 = vadd.f32 %v752_v23, %v623_v33  ;;  %1437 = vmatpush3.msra.mxu0 %v943_v8  ;;  %v783_v37 = vadd.f32 %v1193_v15, %v758_v31 }
 0x272   :  { %v1395_v38 = vpop.f32.mrf.mxu0  ;;  %1438 = vmatprep.subr.mxu0 %v942_v50 }
 0x273   :  { %v782_v39 = vadd.f32 %v1193_v15, %v753_v35  ;;  %v768_v40 = vadd.f32 %v1415_v32, %v1395_v38  ;;  %1427 = vmatprep.mubr.msk.f32.mxu0 %vm512_vm3, %v788_v34  ;;  %v791_v45 = vmax.f32 %v783_v37, 0.0  ;;  %1439 = vmatpush3.msra.mxu0 %v942_v50 }
 0x274   :  { %v633_v42 = vpop.f32.mrf.mxu0  ;;  %1428 = vmatmul.mubr.msk.f32.gmra.mxu0 %vm512_vm3, %v789_v36 }
 0x275   :  { %v790_v43 = vmax.f32 %v782_v39, 0.0  ;;  %v763_v44 = vadd.f32 %v762_v41, %v633_v42  ;;  %v785_v46 = vadd.f32 %v1193_v15, %v768_v40 }
 0x277   :  { %v784_v47 = vadd.f32 %v1193_v15, %v763_v44  ;;  %1430 = vmatprep.mubr.msk.f32.mxu0 %vm512_vm3, %v790_v43  ;;  %v793_v49 = vmax.f32 %v785_v46, 0.0 }
 0x278   :  { %1431 = vmatmul.mubr.msk.f32.gmra.mxu0 %vm512_vm3, %v791_v45 }
 0x279   :  { %v792_v48 = vmax.f32 %v784_v47, 0.0 }
 0x27b   :  { %1433 = vmatprep.mubr.msk.f32.mxu0 %vm512_vm3, %v792_v48 }
 0x27c   :  { %1434 = vmatmul.mubr.msk.f32.gmra.mxu0 %vm512_vm3, %v793_v49 }
 0x330   :  { %v1426_v53 = vpop.f32.mrf.mxu0 }
 0x331   :  { %v901_v54 = vadd.f32 %v1426_v53, %v1194_v52 }
 0x332   :  { %v895_v55 = vpop.f32.mrf.mxu0 }
 0x333   :  { %v896_v56 = vadd.f32 %v1194_v52, %v895_v55  ;;  %v935_v59 = vmax.f32 %v901_v54, 0.0 }
 0x334   :  { %v1429_v57 = vpop.f32.mrf.mxu0 }
 0x335   :  { %v934_v58 = vmax.f32 %v896_v56, 0.0  ;;  %v911_v60 = vadd.f32 %v1429_v57, %v1194_v52 }
 0x336   :  { %v905_v61 = vpop.f32.mrf.mxu0 }
 0x337   :  { %v906_v62 = vadd.f32 %v1194_v52, %v905_v61  ;;  %1440 = vmatprep.mubr.msk.f32.mxu0 %vm951_vm4, %v934_v58  ;;  %v937_v1 = vmax.f32 %v911_v60, 0.0 }
 0x338   :  { %v1432_v63 = vpop.f32.mrf.mxu0  ;;  %1441 = vmatmul.mubr.msk.f32.vlgmr.msra.gmra.mxu0 %vm951_vm4, %v935_v59 }
 0x339   :  { %v936_v0 = vmax.f32 %v906_v62, 0.0  ;;  %v921_v2 = vadd.f32 %v1432_v63, %v1194_v52 }
 0x33a   :  { %v915_v3 = vpop.f32.mrf.mxu0 }
 0x33b   :  { %v916_v4 = vadd.f32 %v1194_v52, %v915_v3  ;;  %1443 = vmatprep.mubr.msk.f32.mxu1 %vm951_vm4, %v936_v0  ;;  %v939_v7 = vmax.f32 %v921_v2, 0.0 }
 0x33c   :  { %v1435_v5 = vpop.f32.mrf.mxu0  ;;  %1444 = vmatmul.mubr.msk.f32.vlgmr.msra.gmra.mxu1 %vm951_vm4, %v937_v1 }
 0x33d   :  { %v938_v6 = vmax.f32 %v916_v4, 0.0  ;;  %v931_v8 = vadd.f32 %v1435_v5, %v1194_v52 }
 0x33e   :  { %v925_v9 = vpop.f32.mrf.mxu0 }
 0x33f   :  { %v926_v10 = vadd.f32 %v1194_v52, %v925_v9  ;;  %1446 = vmatprep.mubr.msk.f32.mxu1 %vm951_vm4, %v938_v6  ;;  %v941_v12 = vmax.f32 %v931_v8, 0.0 }
 0x340   :  { %1447 = vmatmul.mubr.msk.f32.gmra.mxu1 %vm951_vm4, %v939_v7 }
 0x341   :  { %v940_v11 = vmax.f32 %v926_v10, 0.0 }
 0x343   :  { %1449 = vmatprep.mubr.msk.f32.mxu1 %vm951_vm4, %v940_v11 }
 0x344   :  { %1450 = vmatmul.mubr.msk.f32.gmra.mxu1 %vm951_vm4, %v941_v12 }
 0x3f8   :  { %v1442_v14 = vpop.f32.mrf.mxu0 }
 0x3f9   :  { %v1048_v15 = vadd.f32 %v1442_v14, %v1203_v13 }
 0x3fa   :  { %v1042_v16 = vpop.f32.mrf.mxu0 }
 0x3fb   :  { %v1213_v17 = vmul.f32 -1.442695, %v1048_v15  ;;  %v1043_v18 = vadd.f32 %v1203_v13, %v1042_v16 }
 0x3fc   :  { %v1445_v19 = vpop.f32.mrf.mxu1 }
 0x3fd   :  { %1456 = vpow2.f32 %v1213_v17  ;;  %v1212_v20 = vmul.f32 -1.442695, %v1043_v18  ;;  %v1058_v21 = vadd.f32 %v1445_v19, %v1203_v13 }
 0x3fe   :  { %v1052_v22 = vpop.f32.mrf.mxu1 }
 0x3ff   :  { %1458 = vpow2.f32 %v1212_v20  ;;  %v1215_v23 = vmul.f32 -1.442695, %v1058_v21  ;;  %v1053_v24 = vadd.f32 %v1203_v13, %v1052_v22 }
 0x400   :  { %v1448_v25 = vpop.f32.mrf.mxu1 }
 0x401   :  { %1460 = vpow2.f32 %v1215_v23  ;;  %v1214_v26 = vmul.f32 -1.442695, %v1053_v24  ;;  %v1068_v27 = vadd.f32 %v1448_v25, %v1203_v13 }
 0x402   :  { %v1062_v28 = vpop.f32.mrf.mxu1 }
 0x403   :  { %1462 = vpow2.f32 %v1214_v26  ;;  %v1217_v29 = vmul.f32 -1.442695, %v1068_v27  ;;  %v1063_v30 = vadd.f32 %v1203_v13, %v1062_v28 }
 0x404   :  { %v1451_v31 = vpop.f32.mrf.mxu1 }
 0x405   :  { %1464 = vpow2.f32 %v1217_v29  ;;  %v1216_v32 = vmul.f32 -1.442695, %v1063_v30  ;;  %v1078_v33 = vadd.f32 %v1451_v31, %v1203_v13 }
 0x406   :  { %v1072_v34 = vpop.f32.mrf.mxu1 }
 0x407   :  { %1466 = vpow2.f32 %v1216_v32  ;;  %v1219_v35 = vmul.f32 -1.442695, %v1078_v33  ;;  %v1073_v36 = vadd.f32 %v1203_v13, %v1072_v34 }
 0x409   :  { %1468 = vpow2.f32 %v1219_v35  ;;  %v1218_v37 = vmul.f32 -1.442695, %v1073_v36 }
 0x40a   :  { %v1457_v38 = vpop.eup %1456 }
 0x40b   :  { %v1106_v39 = vadd.f32 1.0, %v1457_v38  ;;  %1470 = vpow2.f32 %v1218_v37 }
 0x40c   :  { %v1459_v40 = vpop.eup %1458 }
 0x40d   :  { %1472 = vrcp.f32 %v1106_v39  ;;  %v1105_v41 = vadd.f32 1.0, %v1459_v40 }
 0x40e   :  { %v1461_v42 = vpop.eup %1460 }
 0x40f   :  { %1474 = vrcp.f32 %v1105_v41  ;;  %v1108_v43 = vadd.f32 1.0, %v1461_v42 }
 0x410   :  { %v1463_v44 = vpop.eup %1462 }
 0x411   :  { %1476 = vrcp.f32 %v1108_v43  ;;  %v1107_v45 = vadd.f32 1.0, %v1463_v44 }
 0x412   :  { %v1465_v46 = vpop.eup %1464 }
 0x413   :  { %1478 = vrcp.f32 %v1107_v45  ;;  %v1110_v47 = vadd.f32 1.0, %v1465_v46 }
 0x414   :  { %v1467_v48 = vpop.eup %1466 }
 0x415   :  { %1480 = vrcp.f32 %v1110_v47  ;;  %v1109_v49 = vadd.f32 1.0, %v1467_v48 }
 0x416   :  { %v1469_v50 = vpop.eup %1468 }
 0x417   :  { %1482 = vrcp.f32 %v1109_v49  ;;  %v1112_v51 = vadd.f32 1.0, %v1469_v50 }
 0x418   :  { %v1471_v52 = vpop.eup %1470 }
 0x419   :  { %1484 = vrcp.f32 %v1112_v51  ;;  %v1111_v53 = vadd.f32 1.0, %v1471_v52 }
 0x41a   :  { %v1473_v54 = vpop.eup %1472 }
 0x41b   :  { %1131 = vst.msk [vmem:[%s1808_s11 + $0x8] sm:$0xff] %vm1129_vm5, %v1473_v54  ;;  %1486 = vrcp.f32 %v1111_v53 }
 0x41c   :  { %v1475_v55 = vpop.eup %1474 }
 0x41d   :  { %1130 = vst.msk [vmem:[%s1808_s11] sm:$0xff] %vm1129_vm5, %v1475_v55 }
 0x41e   :  { %v1477_v56 = vpop.eup %1476 }
 0x41f   :  { %1133 = vst.msk [vmem:[%s1808_s11 + $0x18] sm:$0xff] %vm1129_vm5, %v1477_v56 }
 0x420   :  { %v1479_v57 = vpop.eup %1478 }
 0x421   :  { %1132 = vst.msk [vmem:[%s1808_s11 + $0x10] sm:$0xff] %vm1129_vm5, %v1479_v57 }
 0x422   :  { %v1481_v58 = vpop.eup %1480 }
 0x423   :  { %1135 = vst.msk [vmem:[%s1808_s11 + $0x28] sm:$0xff] %vm1129_vm5, %v1481_v58 }
 0x424   :  { %v1483_v59 = vpop.eup %1482 }
 0x425   :  { %1134 = vst.msk [vmem:[%s1808_s11 + $0x20] sm:$0xff] %vm1129_vm5, %v1483_v59 }
 0x426   :  { %v1485_v60 = vpop.eup %1484 }
 0x427   :  { %1137 = vst.msk [vmem:[%s1808_s11 + $0x38] sm:$0xff] %vm1129_vm5, %v1485_v60 }
 0x428   :  { %v1487_v61 = vpop.eup %1486 }
 0x429   :  { %1136 = vst.msk [vmem:[%s1808_s11 + $0x30] sm:$0xff] %vm1129_vm5, %v1487_v61 }

</bundles_post_ra>
